<compile_context>
chip_gen: v6e
topology: v6e:2x2x1
jax: 0.10.0
libtpu: 0.0.40
codegen_flags: <defaults>
</compile_context>

<pallas_src>
import jax
import jax.numpy as jnp
from jax.experimental import pallas as pl
from jax.experimental.pallas import tpu as pltpu


def _pick_hw_tile(hw, c, itemsize, budget_bytes=8 << 20):
    """Largest H*W tile whose double-buffered (C, tile) block fits the budget."""
    cap = max(128, budget_bytes // (2 * c * itemsize))
    if hw <= cap:
        return hw
    # Prefer lane-aligned (multiple of 128) divisors of hw so the BlockSpec
    # (8, 128) constraint is satisfied without padding.
    d = (min(cap, hw) // 128) * 128
    while d >= 128:
        if hw % d == 0:
            return d
        d -= 128
    return hw  # no aligned divisor found; fall back to the full axis


def channel_attention(x, w1, w2):
    """x: (B, C, H, W); w1: (mid, C, 1, 1); w2: (C, mid, 1, 1) (PyTorch OIHW)."""
    B, C, H, W = x.shape
    HW = H * W
    mid = w1.shape[0]

    x2 = x.reshape(B, C, HW)                                  # free reshape
    w1t = jnp.asarray(w1, jnp.float32).reshape(mid, C).T      # (C, mid) = W1^T
    w2m = jnp.asarray(w2, jnp.float32).reshape(C, mid)        # (C, mid) = W2

    hw_tile = _pick_hw_tile(HW, C, x2.dtype.itemsize)
    n_hw = HW // hw_tile
    inv_hw = 1.0 / float(HW)

    def kernel(x_ref, w1t_ref, w2_ref, o_ref, mx_ref, sm_ref):
        t = pl.program_id(1)

        @pl.when(t == 0)
        def _init():
            mx_ref[...] = jnp.full(mx_ref.shape, -jnp.inf, mx_ref.dtype)
            sm_ref[...] = jnp.zeros(sm_ref.shape, sm_ref.dtype)

        xb = x_ref[0].astype(jnp.float32)                     # (C, hw_tile)
        mx_ref[...] = jnp.maximum(mx_ref[...],
                                  jnp.max(xb, axis=-1, keepdims=True))
        sm_ref[...] = sm_ref[...] + jnp.sum(xb, axis=-1, keepdims=True)

        @pl.when(t == pl.num_programs(1) - 1)
        def _finish():
            mx = mx_ref[...]                                  # (C, 1)
            av = sm_ref[...] * inv_hw                         # (C, 1)
            w1t_v = w1t_ref[...]                              # (C, mid)
            w2_v = w2_ref[...]                                # (C, mid)
            # se(v) = W2 @ relu(W1 @ v); the two pooled paths share the MLP,
            # so sum the hidden activations before the second 1x1 conv.
            h = (jnp.maximum(jnp.sum(w1t_v * mx, axis=0, keepdims=True), 0.0)
                 + jnp.maximum(jnp.sum(w1t_v * av, axis=0, keepdims=True), 0.0))
            y = jnp.sum(w2_v * h, axis=1, keepdims=True)      # (C, 1)
            o_ref[0] = jax.nn.sigmoid(y)

    cost = pl.CostEstimate(
        flops=2 * B * C * HW + 6 * B * C * mid,
        transcendentals=B * C,
        bytes_accessed=B * C * HW * x2.dtype.itemsize + 2 * C * mid * 4 + B * C * 4,
    )

    out = pl.pallas_call(
        kernel,
        out_shape=jax.ShapeDtypeStruct((B, C, 1), jnp.float32),
        grid_spec=pltpu.PrefetchScalarGridSpec(
            num_scalar_prefetch=0,
            grid=(B, n_hw),
            in_specs=[
                pl.BlockSpec((1, C, hw_tile), lambda b, t: (b, 0, t)),
                pl.BlockSpec((C, mid), lambda b, t: (0, 0)),
                pl.BlockSpec((C, mid), lambda b, t: (0, 0)),
            ],
            out_specs=pl.BlockSpec((1, C, 1), lambda b, t: (b, 0, 0)),
            scratch_shapes=[pltpu.VMEM((C, 1), jnp.float32),
                            pltpu.VMEM((C, 1), jnp.float32)],
        ),
        compiler_params=pltpu.CompilerParams(
            dimension_semantics=("parallel", "arbitrary")),
        cost_estimate=cost,
    )(x2, w1t, w2m)

    return out.reshape(B, C, 1, 1)


def channel_attention_reference(x, w1, w2):
    """Pure-JAX reference mirroring the PyTorch forward."""
    B, C, H, W = x.shape
    mid = w1.shape[0]
    mx = jnp.max(x, axis=(2, 3))                              # (B, C)
    av = jnp.mean(x, axis=(2, 3))                             # (B, C)
    w1m = w1.reshape(mid, C)
    w2m = w2.reshape(C, mid)

    def se(v):
        h = jnp.maximum(v @ w1m.T, 0.0)                       # (B, mid)
        return h @ w2m.T                                      # (B, C)

    out = jax.nn.sigmoid(se(mx) + se(av))
    return out.reshape(B, C, 1, 1)


if __name__ == "__main__":
    key = jax.random.PRNGKey(0)
    kx, k1, k2 = jax.random.split(key, 3)

    # channel=64, reduction=16 -> hidden=4 (channel must exceed reduction).
    B, C, H, W = 2, 64, 16, 16
    reduction = 16
    mid = C // reduction

    x = jax.random.normal(kx, (B, C, H, W), jnp.float32)

    # PyTorch-style Conv2d(k=1, bias=False) init: U(-1/sqrt(fan_in), +1/sqrt(fan_in)).
    b1 = 1.0 / (C ** 0.5)
    b2 = 1.0 / (mid ** 0.5)
    w1 = jax.random.uniform(k1, (mid, C, 1, 1), jnp.float32, -b1, b1)
    w2 = jax.random.uniform(k2, (C, mid, 1, 1), jnp.float32, -b2, b2)

    out = channel_attention(x, w1, w2)
    out = jax.block_until_ready(out)

    ref = channel_attention_reference(x, w1, w2)
    assert out.shape == (B, C, 1, 1)
    assert jnp.allclose(out, ref, atol=1e-5, rtol=1e-5), (
        f"max err {jnp.max(jnp.abs(out - ref))}")

    print("KERNEL_OK")
</pallas_src>

<mosaic_0001>
module attributes {stable_mosaic.version = 11 : i64} {
  func.func @kernel(%arg0: i32, %arg1: i32, %arg2: memref<1x64x256xf32, #tpu.memory_space<vmem>>, %arg3: memref<64x4xf32, #tpu.memory_space<vmem>>, %arg4: memref<64x4xf32, #tpu.memory_space<vmem>>, %arg5: memref<1x64x1xf32, #tpu.memory_space<vmem>>, %arg6: memref<64x1xf32, #tpu.memory_space<vmem>>, %arg7: memref<64x1xf32, #tpu.memory_space<vmem>>) attributes {dimension_semantics = [#tpu.dimension_semantics<parallel>, #tpu.dimension_semantics<arbitrary>], iteration_bounds = array<i64: 2, 1>, scalar_prefetch = 0 : i64, scratch_operands = 2 : i64, tpu.core_type = #tpu.core_type<tc>, window_params = [{transform_indices = @transform_0, window_bounds = array<i64: 1, 64, 256>}, {pipeline_mode = #tpu.pipeline_mode<synchronous>, transform_indices = @transform_1, window_bounds = array<i64: 64, 4>}, {pipeline_mode = #tpu.pipeline_mode<synchronous>, transform_indices = @transform_2, window_bounds = array<i64: 64, 4>}, {transform_indices = @transform_3, window_bounds = array<i64: 1, 64, 1>}]} {
    %c0_i32 = arith.constant 0 : i32
    %0 = arith.cmpi eq, %arg1, %c0_i32 : i32
    %1 = arith.extui %0 : i1 to i32
    %c0_i32_0 = arith.constant 0 : i32
    %2 = arith.cmpi ne, %1, %c0_i32_0 : i32
    scf.if %2 {
      %cst_14 = arith.constant 0xFF800000 : f32
      %18 = vector.broadcast %cst_14 : f32 to vector<64x1xf32>
      %c0_15 = arith.constant 0 : index
      %c0_16 = arith.constant 0 : index
      %19 = vector.load %arg6[%c0_15, %c0_16] : memref<64x1xf32, #tpu.memory_space<vmem>>, vector<64x1xf32>
      tpu.vector_store %arg6[%c0_15, %c0_16], %18 {strides = array<i32>} : memref<64x1xf32, #tpu.memory_space<vmem>>, vector<64x1xf32>,
      %cst_17 = arith.constant 0.000000e+00 : f32
      %20 = vector.broadcast %cst_17 : f32 to vector<64x1xf32>
      %c0_18 = arith.constant 0 : index
      %c0_19 = arith.constant 0 : index
      %21 = vector.load %arg7[%c0_18, %c0_19] : memref<64x1xf32, #tpu.memory_space<vmem>>, vector<64x1xf32>
      tpu.vector_store %arg7[%c0_18, %c0_19], %20 {strides = array<i32>} : memref<64x1xf32, #tpu.memory_space<vmem>>, vector<64x1xf32>,
    } else {
    }
    %c0 = arith.constant 0 : index
    %c0_1 = arith.constant 0 : index
    %c0_2 = arith.constant 0 : index
    %3 = vector.load %arg2[%c0, %c0_1, %c0_2] : memref<1x64x256xf32, #tpu.memory_space<vmem>>, vector<1x64x256xf32>
    %4 = vector.shape_cast %3 : vector<1x64x256xf32> to vector<64x256xf32>
    %c0_3 = arith.constant 0 : index
    %c0_4 = arith.constant 0 : index
    %5 = vector.load %arg6[%c0_3, %c0_4] : memref<64x1xf32, #tpu.memory_space<vmem>>, vector<64x1xf32>
    %cst = arith.constant dense<0xFF800000> : vector<64xf32>
    %6 = vector.multi_reduction <maximumf>, %4, %cst [1] : vector<64x256xf32> to vector<64xf32>
    %7 = vector.shape_cast %6 : vector<64xf32> to vector<64x1xf32>
    %8 = arith.maximumf %5, %7 : vector<64x1xf32>
    %c0_5 = arith.constant 0 : index
    %c0_6 = arith.constant 0 : index
    %9 = vector.load %arg6[%c0_5, %c0_6] : memref<64x1xf32, #tpu.memory_space<vmem>>, vector<64x1xf32>
    tpu.vector_store %arg6[%c0_5, %c0_6], %8 {strides = array<i32>} : memref<64x1xf32, #tpu.memory_space<vmem>>, vector<64x1xf32>,
    %c0_7 = arith.constant 0 : index
    %c0_8 = arith.constant 0 : index
    %10 = vector.load %arg7[%c0_7, %c0_8] : memref<64x1xf32, #tpu.memory_space<vmem>>, vector<64x1xf32>
    %cst_9 = arith.constant dense<0.000000e+00> : vector<64xf32>
    %11 = vector.multi_reduction <add>, %4, %cst_9 [1] : vector<64x256xf32> to vector<64xf32>
    %12 = vector.shape_cast %11 : vector<64xf32> to vector<64x1xf32>
    %13 = arith.addf %10, %12 : vector<64x1xf32>
    %c0_10 = arith.constant 0 : index
    %c0_11 = arith.constant 0 : index
    %14 = vector.load %arg7[%c0_10, %c0_11] : memref<64x1xf32, #tpu.memory_space<vmem>>, vector<64x1xf32>
    tpu.vector_store %arg7[%c0_10, %c0_11], %13 {strides = array<i32>} : memref<64x1xf32, #tpu.memory_space<vmem>>, vector<64x1xf32>,
    %c0_i32_12 = arith.constant 0 : i32
    %15 = arith.cmpi eq, %arg1, %c0_i32_12 : i32
    %16 = arith.extui %15 : i1 to i32
    %c0_i32_13 = arith.constant 0 : i32
    %17 = arith.cmpi ne, %16, %c0_i32_13 : i32
    scf.if %17 {
      %c0_14 = arith.constant 0 : index
      %c0_15 = arith.constant 0 : index
      %18 = vector.load %arg6[%c0_14, %c0_15] : memref<64x1xf32, #tpu.memory_space<vmem>>, vector<64x1xf32>
      %c0_16 = arith.constant 0 : index
      %c0_17 = arith.constant 0 : index
      %19 = vector.load %arg7[%c0_16, %c0_17] : memref<64x1xf32, #tpu.memory_space<vmem>>, vector<64x1xf32>
      %cst_18 = arith.constant 3.906250e-03 : f32
      %20 = vector.broadcast %cst_18 : f32 to vector<64x1xf32>
      %21 = arith.mulf %19, %20 : vector<64x1xf32>
      %c0_19 = arith.constant 0 : index
      %c0_20 = arith.constant 0 : index
      %22 = vector.load %arg3[%c0_19, %c0_20] : memref<64x4xf32, #tpu.memory_space<vmem>>, vector<64x4xf32>
      %c0_21 = arith.constant 0 : index
      %c0_22 = arith.constant 0 : index
      %23 = vector.load %arg4[%c0_21, %c0_22] : memref<64x4xf32, #tpu.memory_space<vmem>>, vector<64x4xf32>
      %24 = vector.broadcast %18 : vector<64x1xf32> to vector<64x4xf32>
      %25 = arith.mulf %22, %24 : vector<64x4xf32>
      %cst_23 = arith.constant dense<0.000000e+00> : vector<4xf32>
      %26 = vector.multi_reduction <add>, %25, %cst_23 [0] : vector<64x4xf32> to vector<4xf32>
      %27 = vector.shape_cast %26 : vector<4xf32> to vector<1x4xf32>
      %cst_24 = arith.constant 0.000000e+00 : f32
      %28 = vector.broadcast %cst_24 : f32 to vector<1x4xf32>
      %29 = arith.maximumf %27, %28 : vector<1x4xf32>
      %30 = vector.broadcast %21 : vector<64x1xf32> to vector<64x4xf32>
      %31 = arith.mulf %22, %30 : vector<64x4xf32>
      %cst_25 = arith.constant dense<0.000000e+00> : vector<4xf32>
      %32 = vector.multi_reduction <add>, %31, %cst_25 [0] : vector<64x4xf32> to vector<4xf32>
      %33 = vector.shape_cast %32 : vector<4xf32> to vector<1x4xf32>
      %cst_26 = arith.constant 0.000000e+00 : f32
      %34 = vector.broadcast %cst_26 : f32 to vector<1x4xf32>
      %35 = arith.maximumf %33, %34 : vector<1x4xf32>
      %36 = arith.addf %29, %35 : vector<1x4xf32>
      %37 = vector.broadcast %36 : vector<1x4xf32> to vector<64x4xf32>
      %38 = arith.mulf %23, %37 : vector<64x4xf32>
      %cst_27 = arith.constant dense<0.000000e+00> : vector<64xf32>
      %39 = vector.multi_reduction <add>, %38, %cst_27 [1] : vector<64x4xf32> to vector<64xf32>
      %40 = vector.shape_cast %39 : vector<64xf32> to vector<64x1xf32>
      %41 = arith.negf %40 : vector<64x1xf32>
      %42 = math.exp %41 : vector<64x1xf32>
      %cst_28 = arith.constant 1.000000e+00 : f32
      %43 = vector.broadcast %cst_28 : f32 to vector<64x1xf32>
      %44 = arith.addf %43, %42 : vector<64x1xf32>
      %45 = arith.divf %43, %44 : vector<64x1xf32>
      %c0_29 = arith.constant 0 : index
      %c0_30 = arith.constant 0 : index
      %c0_31 = arith.constant 0 : index
      %46 = vector.load %arg5[%c0_29, %c0_30, %c0_31] : memref<1x64x1xf32, #tpu.memory_space<vmem>>, vector<1x64x1xf32>
      %47 = vector.shape_cast %46 : vector<1x64x1xf32> to vector<64x1xf32>
      %48 = vector.shape_cast %45 : vector<64x1xf32> to vector<1x64x1xf32>
      tpu.vector_store %arg5[%c0_29, %c0_30, %c0_31], %48 {strides = array<i32>} : memref<1x64x1xf32, #tpu.memory_space<vmem>>, vector<1x64x1xf32>,
    } else {
    }
    return
  }
  func.func @transform_0(%arg0: i32, %arg1: i32) -> (i32, i32, i32) {
    %c0_i32 = arith.constant 0 : i32
    %c0_i32_0 = arith.constant 0 : i32
    return %arg0, %c0_i32, %arg1 : i32, i32, i32
  }
  func.func @transform_1(%arg0: i32, %arg1: i32) -> (i32, i32) {
    %c0_i32 = arith.constant 0 : i32
    %c0_i32_0 = arith.constant 0 : i32
    %c0_i32_1 = arith.constant 0 : i32
    return %c0_i32, %c0_i32_0 : i32, i32
  }
  func.func @transform_2(%arg0: i32, %arg1: i32) -> (i32, i32) {
    %c0_i32 = arith.constant 0 : i32
    %c0_i32_0 = arith.constant 0 : i32
    %c0_i32_1 = arith.constant 0 : i32
    return %c0_i32, %c0_i32_0 : i32, i32
  }
  func.func @transform_3(%arg0: i32, %arg1: i32) -> (i32, i32, i32) {
    %c0_i32 = arith.constant 0 : i32
    %c0_i32_0 = arith.constant 0 : i32
    %c0_i32_1 = arith.constant 0 : i32
    return %arg0, %c0_i32, %c0_i32_0 : i32, i32, i32
  }
}

</mosaic_0001>

<bundles_post_ra>
// kernel: tpu_custom_call.1
= control target key start
LH: loop header
LB: loop body
LE: loop exit
PB: predicated region body
PF: predicated region fallthrough
CT: control target
= control target key end

     0   :  { %8 = vsyncpa [#allocation5], 0  ;;  %s1142_s0 = inlined_call_operand.hbm [shape: f32[2,64,256], index: 0, kind: input, shape index: {}]   ;;  %s1143_s1 = inlined_call_operand.vmem [shape: f32[64,4], index: 1, kind: input, shape index: {}]   ;;  %s1144_s2 = inlined_call_operand.vmem [shape: f32[64,4], index: 2, kind: input, shape index: {}]   ;;  %s1145_s3 = inlined_call_operand.vmem [shape: f32[2,64,1], index: 3, kind: output, shape index: {}]  }
   0x1   :  { %10 = vsyncpa [#allocation5 + $0x1], 0  ;;  %s916_s12 = smov 0   ;;  %s918_s13 = smov 0  }
   0x2   :  { %s920_s14 = smov 0   ;;  %s922_s15 = smov 0  }
   0x3   :  { %s924_s16 = smov 0   ;;  %s926_s17 = smov 0  }
   0x4 LB: > { %s693_s18 = sadd.s32 4294967295, %s888_s17   ;;  %s28_s19 = sadd.s32 1, %s884_s16  ;;  %s888_s17 = sphi %s926_s17, %s16_s17   ;;  %s884_s16 = sphi %s924_s16, %s1153_s16   ;;  %s880_s15 = sphi %s922_s15, %s1152_s15   ;;  %s876_s14 = sphi %s920_s14, %s1151_s14   ;;  %s872_s13 = sphi %s918_s13, %s1150_s13   ;;  %s868_s12 = sphi %s916_s12, %s1149_s12  }
   0x5   : > { %p30_p0 = scmp.ge.s32.totalorder %s28_s19, 2  ;;  %s37_s20 = sadd.s32 1, %s876_s14 }
   0x6   : > { %p44_p1 = scmp.ne.s32.totalorder %s876_s14, %s872_s13  ;;  %p45_p2 = scmp.eq.s32.totalorder %s888_s17, 0 }
   0x7   : > { %s1155_s19 = smov (%p30_p0, %s28_s19), 0  ;;  %p50_p4 = scmp.ne.s32.totalorder %s872_s13, %s868_s12 }
   0x8   : > { %p952_p3 = por %p45_p2, %p44_p1  ;;  %s32_s22 = ssub.s32 %s884_s16, %s1155_s19 }
   0x9   : > { %p51_p5 = scmp.eq.s32.totalorder %s693_s18, 0  ;;  %p35_p6 = scmp.eq.s32.totalorder %s32_s22, 0 }
   0xa   : > { %p722_p8 = scmp.lt.s32.totalorder %s888_s17, 2  ;;  %s148_s25 = sand.u32 1, %s876_s14  }
   0xb   : > { %p959_p7 = por %p51_p5, %p50_p4  ;;  %s714_s26 = sshll.u32 %s884_s16, 11 }
   0xc   : > { %s965_s24 = scalar_select %p35_p6, %s876_s14, %s37_s20  }
   0xd   : > { %s697_s27 = sshll.u32 %s148_s25, 7  ;;  %s160_s30 = scalar_lea.hbm %s1142_s0, %s714_s26 }
   0xe   : > { %s152_s4 = scalar_lea.vmem [#allocation4], %s697_s27  ;;  %p974_p9 = pnand %p722_p8, %p952_p3 }
   0xf   : > { %s161_s5 = sshll.u32 %s152_s4, 4  ;;  %s149_s7 = scalar_lea.sflag [#allocation5], %s148_s25  ;;  %s162_s5 = int_to_ptr.vmem [resolvable:$true] %s161_s5 }
  0x10   : > { %p812_p10 = pneg %p974_p9  ;;  %s823_s8 = scalar_lea.vmem %s162_s5, 2048 }
  0x11   : > { %p824_p11 = scmp.ne.s32.totalorder %s162_s5, %s823_s8  ;;  %s890_s9 = smov [#allocation4]  }
  0x12   : > { %s828_s10 = sshll.u32 %s890_s9, 4  ;;  %s829_s10 = int_to_ptr.vmem [resolvable:$false] %s828_s10 }
  0x13   : > { %p826_p12 = pnand %p824_p11, %p812_p10  ;;  %s830_s11 = scalar_lea.vmem %s829_s10, 4096 }
  0x14   : > { %p831_p0 = scmp.lt.s32.totalorder %s162_s5, %s829_s10  ;;  %p832_p1 = scmp.lt.s32.totalorder %s830_s11, %s823_s8 }
  0x15   : > { %p827_p13 = pneg %p826_p12 }
  0x16   : > { %p833_p2 = por %p832_p1, %p831_p0 }
  0x18   : > { %p834_p3 = pnand %p833_p2, %p827_p13 }
  0x1a   : > { %837 = shalt.err (!%p834_p3)
}
  0x1b   : > { %s891_s12 = smov 256   ;;  %s892_s18 = smov 16  }
  0x1c   : > { %721 = dma.hbm_to_vmem [thread:$0]  (!%p974_p9), %s160_s30, 2048, %s162_s5, %s149_s7, %s891_s12, %s891_s12, %s892_s18  }
  0x1d   : > { %p700_p4 = scmp.ge.s32.totalorder %s888_s17, 1  ;;  %p169_p5 = scmp.lt.s32.totalorder %s888_s17, 3 }
  0x1f   : > { %p170_p6 = pnand %p700_p4, %p169_p5 }
  0x20   : > { %s175_s20 = sand.u32 (!%p170_p6), 1, %s872_s13  }
  0x21   : > { %173 = sbr.rel (%p170_p6) target bundleno = 566 (0x236), region = 32  ;;  %s701_s21 = sshll.u32 (!%p170_p6), %s175_s20, 7 }
  0x22   : > { %s176_s22 = scalar_lea.sflag (!%p170_p6), [#allocation5], %s175_s20  ;;  %s985_s25 = scalar_lea.vmem (!%p170_p6), [#allocation4], %s701_s21 }
  0x26   : > { %863 = dma.done.wait (%p959_p7), %s176_s22, 2048  }
  0x27   : > { %865 = vsyncadd (%p959_p7), %s176_s22, 4294965248  ;;  %vm212_vm0 = vcmask 7168   ;;  %v893_v0 = vmov 0.0   ;;  %v229_v1 = vld [vmem:[%s985_s25] sm:$0xff]  ;;  %v230_v2 = vld [vmem:[%s985_s25 + $0x8] sm:$0xff]  ;;  %v894_v11 = vmov -inf  }
  0x28   : > { %221 = vst.msk [vmem:[#allocation3] sm:$0xff] %vm212_vm0, %v893_v0  ;;  %222 = vst.msk [vmem:[#allocation3 + $0x8] sm:$0xff] %vm212_vm0, %v893_v0  ;;  %v231_v3 = vld [vmem:[%s985_s25 + $0x10] sm:$0xff]  ;;  %v302_v4 = vadd.f32 %v230_v2, %v229_v1  ;;  %v253_v5 = vmax.f32 %v229_v1, %v230_v2  ;;  %v232_v6 = vld [vmem:[%s985_s25 + $0x18] sm:$0xff]  ;;  %v895_v28 = vmov 0   ;;  %vm433_vm1 = vcmask 31744  }
  0x29   : > { %223 = vst.msk [vmem:[#allocation3 + $0x10] sm:$0xff] %vm212_vm0, %v893_v0  ;;  %224 = vst.msk [vmem:[#allocation3 + $0x18] sm:$0xff] %vm212_vm0, %v893_v0  ;;  %v305_v7 = vadd.f32 %v232_v6, %v231_v3  ;;  %v256_v8 = vmax.f32 %v231_v3, %v232_v6  ;;  %v233_v9 = vld [vmem:[%s985_s25 + $0x20] sm:$0xff]  ;;  %v234_v10 = vld [vmem:[%s985_s25 + $0x28] sm:$0xff]  ;;  %776 = vset.pattern.permute.xlu0 %v895_v28  ;;  %777 = vset.pattern.permute.xlu1 %v895_v28  ;;  %p203_p7 = scmp.lt.s32.totalorder %s880_s15, 1 }
  0x2a   : > { %225 = vst.msk [vmem:[#allocation3 + $0x20] sm:$0xff] %vm212_vm0, %v893_v0  ;;  %226 = vst.msk [vmem:[#allocation3 + $0x28] sm:$0xff] %vm212_vm0, %v893_v0  ;;  %303 = vadd.xlane.f32.xlu0 %v302_v4  ;;  %254 = vmax.xlane.f32.xlu1 %v253_v5  ;;  %v308_v12 = vadd.f32 %v234_v10, %v233_v9  ;;  %v259_v13 = vmax.f32 %v233_v9, %v234_v10  ;;  %v235_v14 = vld [vmem:[%s985_s25 + $0x30] sm:$0xff]  ;;  %v236_v15 = vld [vmem:[%s985_s25 + $0x38] sm:$0xff] }
  0x2b   : > { %227 = vst.msk [vmem:[#allocation3 + $0x30] sm:$0xff] %vm212_vm0, %v893_v0  ;;  %228 = vst.msk [vmem:[#allocation3 + $0x38] sm:$0xff] %vm212_vm0, %v893_v0  ;;  %v311_v16 = vadd.f32 %v236_v15, %v235_v14  ;;  %v262_v17 = vmax.f32 %v235_v14, %v236_v15  ;;  %v237_v18 = vld [vmem:[%s985_s25 + $0x40] sm:$0xff]  ;;  %v238_v19 = vld [vmem:[%s985_s25 + $0x48] sm:$0xff]  ;;  %s1157_s15 = smov (!%p203_p7, %s880_s15), 1 }
  0x2c   : > { %213 = vst.msk [vmem:[#allocation2] sm:$0xff] %vm212_vm0, %v894_v11  ;;  %214 = vst.msk [vmem:[#allocation2 + $0x8] sm:$0xff] %vm212_vm0, %v894_v11  ;;  %v314_v20 = vadd.f32 %v238_v19, %v237_v18  ;;  %v265_v21 = vmax.f32 %v237_v18, %v238_v19  ;;  %v239_v22 = vld [vmem:[%s985_s25 + $0x50] sm:$0xff]  ;;  %v240_v23 = vld [vmem:[%s985_s25 + $0x58] sm:$0xff]  ;;  %s715_s10 = sshll.u32 %s1157_s15, 6 }
  0x2d   : > { %215 = vst.msk [vmem:[#allocation2 + $0x10] sm:$0xff] %vm212_vm0, %v894_v11  ;;  %216 = vst.msk [vmem:[#allocation2 + $0x18] sm:$0xff] %vm212_vm0, %v894_v11  ;;  %v317_v24 = vadd.f32 %v240_v23, %v239_v22  ;;  %v268_v25 = vmax.f32 %v239_v22, %v240_v23  ;;  %v241_v26 = vld [vmem:[%s985_s25 + $0x60] sm:$0xff]  ;;  %v242_v27 = vld [vmem:[%s985_s25 + $0x68] sm:$0xff]  ;;  %s207_s18 = scalar_lea.vmem %s1145_s3, %s715_s10 }
  0x2e   : > { %217 = vst.msk [vmem:[#allocation2 + $0x20] sm:$0xff] %vm212_vm0, %v894_v11  ;;  %218 = vst.msk [vmem:[#allocation2 + $0x28] sm:$0xff] %vm212_vm0, %v894_v11  ;;  %306 = vadd.xlane.f32.xlu0 %v305_v7  ;;  %257 = vmax.xlane.f32.xlu1 %v256_v8  ;;  %v320_v29 = vadd.f32 %v242_v27, %v241_v26  ;;  %v271_v30 = vmax.f32 %v241_v26, %v242_v27  ;;  %v243_v31 = vld [vmem:[%s985_s25 + $0x70] sm:$0xff]  ;;  %v244_v32 = vld [vmem:[%s985_s25 + $0x78] sm:$0xff] }
  0x2f   : > { %219 = vst.msk [vmem:[#allocation2 + $0x30] sm:$0xff] %vm212_vm0, %v894_v11  ;;  %220 = vst.msk [vmem:[#allocation2 + $0x38] sm:$0xff] %vm212_vm0, %v894_v11  ;;  %v323_v33 = vadd.f32 %v244_v32, %v243_v31  ;;  %v274_v34 = vmax.f32 %v243_v31, %v244_v32  ;;  %v294_v35 = vld [vmem:[#allocation3] sm:$0xff]  ;;  %v295_v41 = vld [vmem:[#allocation3 + $0x8] sm:$0xff] }
  0x30   : > { %v296_v47 = vld [vmem:[#allocation3 + $0x10] sm:$0xff]  ;;  %v297_v54 = vld [vmem:[#allocation3 + $0x18] sm:$0xff] }
  0x31   : > { %v298_v61 = vld [vmem:[#allocation3 + $0x20] sm:$0xff]  ;;  %v299_v4 = vld [vmem:[#allocation3 + $0x28] sm:$0xff] }
  0x32   : > { %309 = vadd.xlane.f32.xlu0 %v308_v12  ;;  %260 = vmax.xlane.f32.xlu1 %v259_v13  ;;  %v300_v11 = vld [vmem:[#allocation3 + $0x30] sm:$0xff] }
  0x33   : > { %v245_v36 = vld [vmem:[#allocation2] sm:$0xff]  ;;  %v246_v42 = vld [vmem:[#allocation2 + $0x8] sm:$0xff] }
  0x34   : > { %v247_v48 = vld [vmem:[#allocation2 + $0x10] sm:$0xff]  ;;  %v248_v55 = vld [vmem:[#allocation2 + $0x18] sm:$0xff] }
  0x35   : > { %v249_v62 = vld [vmem:[#allocation2 + $0x20] sm:$0xff]  ;;  %v250_v5 = vld [vmem:[#allocation2 + $0x28] sm:$0xff] }
  0x36   : > { %312 = vadd.xlane.f32.xlu0 %v311_v16  ;;  %263 = vmax.xlane.f32.xlu1 %v262_v17  ;;  %v251_v12 = vld [vmem:[#allocation2 + $0x30] sm:$0xff]  ;;  %v301_v16 = vld [vmem:[#allocation3 + $0x38] sm:$0xff] }
  0x3a   : > { %315 = vadd.xlane.f32.xlu0 %v314_v20  ;;  %266 = vmax.xlane.f32.xlu1 %v265_v21  ;;  %v252_v20 = vld [vmem:[#allocation2 + $0x38] sm:$0xff] }
  0x3e   : > { %318 = vadd.xlane.f32.xlu0 %v317_v24  ;;  %269 = vmax.xlane.f32.xlu1 %v268_v25 }
  0x42   : > { %321 = vadd.xlane.f32.xlu0 %v320_v29  ;;  %272 = vmax.xlane.f32.xlu1 %v271_v30 }
  0x46   : > { %324 = vadd.xlane.f32.xlu0 %v323_v33  ;;  %275 = vmax.xlane.f32.xlu1 %v274_v34 }
  0xb3   : > { %v304_v37 = vpop.xlane.xlu0 %303  ;;  %v255_v38 = vpop.xlane.xlu1 %254 }
  0xb4   : > { %v326_v39 = vadd.f32 %v304_v37, %v294_v35  ;;  %v277_v40 = vmax.f32 %v245_v36, %v255_v38 }
  0xb6   : > { %334 = vst.msk [vmem:[#allocation3] sm:$0xff] %vm212_vm0, %v326_v39  ;;  %286 = vst.msk [vmem:[#allocation2] sm:$0xff] %vm212_vm0, %v277_v40 }
  0xb7   : > { %v307_v43 = vpop.xlane.xlu0 %306  ;;  %v258_v44 = vpop.xlane.xlu1 %257 }
  0xb8   : > { %v327_v45 = vadd.f32 %v307_v43, %v295_v41  ;;  %v278_v46 = vmax.f32 %v246_v42, %v258_v44 }
  0xba   : > { %335 = vst.msk [vmem:[#allocation3 + $0x8] sm:$0xff] %vm212_vm0, %v327_v45  ;;  %287 = vst.msk [vmem:[#allocation2 + $0x8] sm:$0xff] %vm212_vm0, %v278_v46 }
  0xbb   : > { %v310_v49 = vpop.xlane.xlu0 %309  ;;  %v261_v50 = vpop.xlane.xlu1 %260 }
  0xbc   : > { %v328_v51 = vadd.f32 %v310_v49, %v296_v47  ;;  %v279_v52 = vmax.f32 %v247_v48, %v261_v50 }
  0xbd   : > { %v345_v53 = vld [vmem:[#allocation2] sm:$0xff] }
  0xbe   : > { %336 = vst.msk [vmem:[#allocation3 + $0x10] sm:$0xff] %vm212_vm0, %v328_v51  ;;  %288 = vst.msk [vmem:[#allocation2 + $0x10] sm:$0xff] %vm212_vm0, %v279_v52  ;;  %387 = vperm.xlu0 %776, %v345_v53   ;;  %v353_v28 = vld [vmem:[#allocation3] sm:$0xff]  ;;  %v370_v51 = vld [vmem:[%s1143_s1 + $0x8] sm:$0xff] }
  0xbf   : > { %v313_v56 = vpop.xlane.xlu0 %312  ;;  %v264_v57 = vpop.xlane.xlu1 %263  ;;  %v361_v30 = vmul.f32 0.00390625, %v353_v28  ;;  %v369_v52 = vld [vmem:[%s1143_s1] sm:$0xff]  ;;  %v371_v53 = vld [vmem:[%s1143_s1 + $0x10] sm:$0xff] }
  0xc0   : > { %v329_v58 = vadd.f32 %v313_v56, %v297_v54  ;;  %v280_v59 = vmax.f32 %v248_v55, %v264_v57 }
  0xc1   : > { %v346_v60 = vld [vmem:[#allocation2 + $0x8] sm:$0xff] }
  0xc2   : > { %337 = vst.msk [vmem:[#allocation3 + $0x18] sm:$0xff] %vm212_vm0, %v329_v58  ;;  %289 = vst.msk [vmem:[#allocation2 + $0x18] sm:$0xff] %vm212_vm0, %v280_v59  ;;  %392 = vperm.xlu1 %777, %v346_v60   ;;  %v354_v32 = vld [vmem:[#allocation3 + $0x8] sm:$0xff]  ;;  %v372_v59 = vld [vmem:[%s1143_s1 + $0x18] sm:$0xff] }
  0xc3   : > { %v316_v63 = vpop.xlane.xlu0 %315  ;;  %v267_v0 = vpop.xlane.xlu1 %266  ;;  %v362_v34 = vmul.f32 0.00390625, %v354_v32 }
  0xc4   : > { %v330_v1 = vadd.f32 %v316_v63, %v298_v61  ;;  %v281_v2 = vmax.f32 %v249_v62, %v267_v0  ;;  %v373_v62 = vld [vmem:[%s1143_s1 + $0x20] sm:$0xff] }
  0xc5   : > { %v347_v3 = vld [vmem:[#allocation2 + $0x10] sm:$0xff] }
  0xc6   : > { %338 = vst.msk [vmem:[#allocation3 + $0x20] sm:$0xff] %vm212_vm0, %v330_v1  ;;  %290 = vst.msk [vmem:[#allocation2 + $0x20] sm:$0xff] %vm212_vm0, %v281_v2  ;;  %397 = vperm.xlu1 %777, %v347_v3   ;;  %v355_v36 = vld [vmem:[#allocation3 + $0x10] sm:$0xff] }
  0xc7   : > { %v319_v6 = vpop.xlane.xlu0 %318  ;;  %v270_v7 = vpop.xlane.xlu1 %269  ;;  %v363_v38 = vmul.f32 0.00390625, %v355_v36 }
  0xc8   : > { %v331_v8 = vadd.f32 %v319_v6, %v299_v4  ;;  %v282_v9 = vmax.f32 %v250_v5, %v270_v7  ;;  %v374_v5 = vld [vmem:[%s1143_s1 + $0x28] sm:$0xff] }
  0xc9   : > { %v348_v10 = vld [vmem:[#allocation2 + $0x18] sm:$0xff] }
  0xca   : > { %339 = vst.msk [vmem:[#allocation3 + $0x28] sm:$0xff] %vm212_vm0, %v331_v8  ;;  %291 = vst.msk [vmem:[#allocation2 + $0x28] sm:$0xff] %vm212_vm0, %v282_v9  ;;  %402 = vperm.xlu1 %777, %v348_v10   ;;  %v356_v39 = vld [vmem:[#allocation3 + $0x18] sm:$0xff] }
  0xcb   : > { %v322_v13 = vpop.xlane.xlu0 %321  ;;  %v273_v14 = vpop.xlane.xlu1 %272  ;;  %v364_v40 = vmul.f32 0.00390625, %v356_v39 }
  0xcc   : > { %v332_v15 = vadd.f32 %v322_v13, %v300_v11  ;;  %v283_v17 = vmax.f32 %v251_v12, %v273_v14 }
  0xcd   : > { %v349_v18 = vld [vmem:[#allocation2 + $0x20] sm:$0xff] }
  0xce   : > { %v357_v19 = vld [vmem:[#allocation3 + $0x20] sm:$0xff]  ;;  %340 = vst.msk [vmem:[#allocation3 + $0x30] sm:$0xff] %vm212_vm0, %v332_v15  ;;  %407 = vperm.xlu1 %777, %v349_v18   ;;  %292 = vst.msk [vmem:[#allocation2 + $0x30] sm:$0xff] %vm212_vm0, %v283_v17 }
  0xcf   : > { %v365_v21 = vmul.f32 0.00390625, %v357_v19  ;;  %v325_v22 = vpop.xlane.xlu0 %324  ;;  %v276_v23 = vpop.xlane.xlu1 %275  ;;  %v375_v19 = vld [vmem:[%s1143_s1 + $0x30] sm:$0xff] }
  0xd0   : > { %v333_v24 = vadd.f32 %v325_v22, %v301_v16  ;;  %v284_v25 = vmax.f32 %v252_v20, %v276_v23 }
  0xd1   : > { %478 = vperm.xlu0 %776, %v365_v21   ;;  %v350_v26 = vld [vmem:[#allocation2 + $0x28] sm:$0xff] }
  0xd2   : > { %v358_v27 = vld [vmem:[#allocation3 + $0x28] sm:$0xff]  ;;  %341 = vst.msk [vmem:[#allocation3 + $0x38] sm:$0xff] %vm212_vm0, %v333_v24  ;;  %412 = vperm.xlu1 %777, %v350_v26   ;;  %293 = vst.msk [vmem:[#allocation2 + $0x38] sm:$0xff] %vm212_vm0, %v284_v25  ;;  %v376_v25 = vld [vmem:[%s1143_s1 + $0x38] sm:$0xff] }
  0xd3   : > { %v366_v29 = vmul.f32 0.00390625, %v358_v27 }
  0xd5   : > { %483 = vperm.xlu0 %776, %v366_v29   ;;  %v359_v31 = vld [vmem:[#allocation3 + $0x30] sm:$0xff] }
  0xd6   : > { %458 = vperm.xlu1 %777, %v361_v30   ;;  %v367_v33 = vmul.f32 0.00390625, %v359_v31  ;;  %v351_v41 = vld [vmem:[#allocation2 + $0x30] sm:$0xff] }
  0xd9   : > { %488 = vperm.xlu0 %776, %v367_v33   ;;  %v360_v35 = vld [vmem:[#allocation3 + $0x38] sm:$0xff] }
  0xda   : > { %463 = vperm.xlu1 %777, %v362_v34   ;;  %v368_v37 = vmul.f32 0.00390625, %v360_v35  ;;  %v352_v42 = vld [vmem:[#allocation2 + $0x38] sm:$0xff] }
  0xdd   : > { %493 = vperm.xlu0 %776, %v368_v37  }
  0xde   : > { %468 = vperm.xlu1 %777, %v363_v38  }
  0xe2   : > { %473 = vperm.xlu1 %777, %v364_v40  }
  0xe6   : > { %417 = vperm.xlu1 %777, %v351_v41  }
  0xea   : > { %422 = vperm.xlu1 %777, %v352_v42  }
 0x139   : > { %v388_v47 = vpop.permute.xlu0 %387 }
 0x13a   : > { %v425_v58 = vmul.f32 %v388_v47, %v369_v52 }
 0x13c   : > { %v434_v4 = vsel %vm433_vm1, %v425_v58, 0.0 }
 0x13d   : > { %v393_v43 = vpop.permute.xlu1 %392 }
 0x13e   : > { %v426_v56 = vmul.f32 %v393_v43, %v370_v51 }
 0x140   : > { %v435_v0 = vsel %vm433_vm1, %v426_v56, 0.0 }
 0x141   : > { %v398_v44 = vpop.permute.xlu1 %397  ;;  %v436_v11 = vadd.f32 %v435_v0, %v434_v4  ;;  %v377_v0 = vld [vmem:[%s1144_s2] sm:$0xff] }
 0x142   : > { %v427_v60 = vmul.f32 %v398_v44, %v371_v53 }
 0x144   : > { %v437_v7 = vsel %vm433_vm1, %v427_v60, 0.0 }
 0x145   : > { %v403_v45 = vpop.permute.xlu1 %402  ;;  %v438_v18 = vadd.f32 %v437_v7, %v436_v11  ;;  %v382_v11 = vld [vmem:[%s1144_s2 + $0x28] sm:$0xff] }
 0x146   : > { %v428_v1 = vmul.f32 %v403_v45, %v372_v59 }
 0x148   : > { %v439_v14 = vsel %vm433_vm1, %v428_v1, 0.0 }
 0x149   : > { %v408_v46 = vpop.permute.xlu1 %407  ;;  %v440_v24 = vadd.f32 %v439_v14, %v438_v18 }
 0x14a   : > { %v429_v8 = vmul.f32 %v408_v46, %v373_v62 }
 0x14c   : > { %v479_v49 = vpop.permute.xlu0 %478  ;;  %v441_v21 = vsel %vm433_vm1, %v429_v8, 0.0 }
 0x14d   : > { %v413_v48 = vpop.permute.xlu1 %412  ;;  %v500_v15 = vmul.f32 %v479_v49, %v373_v62  ;;  %v442_v33 = vadd.f32 %v441_v21, %v440_v24 }
 0x14e   : > { %v430_v16 = vmul.f32 %v413_v48, %v374_v5 }
 0x14f   : > { %v511_v29 = vsel %vm433_vm1, %v500_v15, 0.0 }
 0x150   : > { %v484_v54 = vpop.permute.xlu0 %483  ;;  %v443_v30 = vsel %vm433_vm1, %v430_v16, 0.0  ;;  %v383_v16 = vld [vmem:[%s1144_s2 + $0x30] sm:$0xff] }
 0x151   : > { %v459_v50 = vpop.permute.xlu1 %458  ;;  %v501_v22 = vmul.f32 %v484_v54, %v374_v5  ;;  %v444_v38 = vadd.f32 %v443_v30, %v442_v33 }
 0x152   : > { %v496_v61 = vmul.f32 %v459_v50, %v369_v52 }
 0x153   : > { %v513_v35 = vsel %vm433_vm1, %v501_v22, 0.0 }
 0x154   : > { %v489_v6 = vpop.permute.xlu0 %488  ;;  %v504_v9 = vsel %vm433_vm1, %v496_v61, 0.0 }
 0x155   : > { %v464_v55 = vpop.permute.xlu1 %463  ;;  %v502_v31 = vmul.f32 %v489_v6, %v375_v19 }
 0x156   : > { %v497_v57 = vmul.f32 %v464_v55, %v370_v51 }
 0x157   : > { %v515_v41 = vsel %vm433_vm1, %v502_v31, 0.0 }
 0x158   : > { %v505_v2 = vsel %vm433_vm1, %v497_v57, 0.0  ;;  %v494_v26 = vpop.permute.xlu0 %493 }
 0x159   : > { %v469_v63 = vpop.permute.xlu1 %468  ;;  %v506_v12 = vadd.f32 %v505_v2, %v504_v9  ;;  %v503_v36 = vmul.f32 %v494_v26, %v376_v25  ;;  %v379_v2 = vld [vmem:[%s1144_s2 + $0x10] sm:$0xff] }
 0x15a   : > { %v498_v3 = vmul.f32 %v469_v63, %v371_v53  ;;  %v378_v63 = vld [vmem:[%s1144_s2 + $0x8] sm:$0xff] }
 0x15b   : > { %v517_v45 = vsel %vm433_vm1, %v503_v36, 0.0 }
 0x15c   : > { %v507_v10 = vsel %vm433_vm1, %v498_v3, 0.0  ;;  %v380_v3 = vld [vmem:[%s1144_s2 + $0x18] sm:$0xff] }
 0x15d   : > { %v474_v13 = vpop.permute.xlu1 %473  ;;  %v508_v20 = vadd.f32 %v507_v10, %v506_v12  ;;  %v381_v10 = vld [vmem:[%s1144_s2 + $0x20] sm:$0xff] }
 0x15e   : > { %v499_v17 = vmul.f32 %v474_v13, %v372_v59 }
 0x160   : > { %v509_v23 = vsel %vm433_vm1, %v499_v17, 0.0  ;;  %v384_v17 = vld [vmem:[%s1144_s2 + $0x38] sm:$0xff] }
 0x161   : > { %v510_v27 = vadd.f32 %v509_v23, %v508_v20  ;;  %v418_v28 = vpop.permute.xlu1 %417 }
 0x162   : > { %v431_v32 = vmul.f32 %v418_v28, %v375_v19 }
 0x163   : > { %v512_v34 = vadd.f32 %v511_v29, %v510_v27 }
 0x164   : > { %v445_v37 = vsel %vm433_vm1, %v431_v32, 0.0 }
 0x165   : > { %v514_v39 = vadd.f32 %v513_v35, %v512_v34  ;;  %v423_v40 = vpop.permute.xlu1 %422  ;;  %v446_v44 = vadd.f32 %v445_v37, %v444_v38 }
 0x166   : > { %v432_v42 = vmul.f32 %v423_v40, %v376_v25 }
 0x167   : > { %v516_v43 = vadd.f32 %v515_v41, %v514_v39 }
 0x168   : > { %v447_v46 = vsel %vm433_vm1, %v432_v42, 0.0 }
 0x169   : > { %v518_v47 = vadd.f32 %v517_v45, %v516_v43  ;;  %v448_v48 = vadd.f32 %v447_v46, %v446_v44 }
 0x16b   : > { %v519_v49 = vrot.slane %v518_v47, 4  ;;  %v449_v50 = vrot.slane %v448_v48, 4 }
 0x16d   : > { %v520_v51 = vadd.f32 %v519_v49, %v518_v47  ;;  %v450_v52 = vadd.f32 %v449_v50, %v448_v48 }
 0x16f   : > { %v521_v53 = vrot.slane %v520_v51, 2  ;;  %v451_v54 = vrot.slane %v450_v52, 2 }
 0x171   : > { %v522_v55 = vadd.f32 %v521_v53, %v520_v51  ;;  %v452_v56 = vadd.f32 %v451_v54, %v450_v52 }
 0x173   : > { %v453_v57 = vrot.slane %v452_v56, 1  ;;  %v523_v58 = vrot.slane %v522_v55, 1 }
 0x175   : > { %v454_v59 = vadd.f32 %v453_v57, %v452_v56  ;;  %v524_v60 = vadd.f32 %v523_v58, %v522_v55 }
 0x177   : > { %v455_v61 = vmax.f32 %v454_v59, 0.0  ;;  %v525_v62 = vmax.f32 %v524_v60, 0.0 }
 0x179   : > { %v526_v1 = vadd.f32 %v525_v62, %v455_v61 }
 0x17b   : > { %v528_v4 = vmul.f32 %v526_v1, %v378_v63  ;;  %v527_v5 = vmul.f32 %v526_v1, %v377_v0  ;;  %v529_v8 = vmul.f32 %v526_v1, %v379_v2  ;;  %v530_v9 = vmul.f32 %v526_v1, %v380_v3 }
 0x17c   : > { %v531_v14 = vmul.f32 %v526_v1, %v381_v10  ;;  %v532_v15 = vmul.f32 %v526_v1, %v382_v11  ;;  %v533_v20 = vmul.f32 %v526_v1, %v383_v16  ;;  %v534_v21 = vmul.f32 %v526_v1, %v384_v17 }
 0x17d   : > { %v538_v6 = vsel %vm433_vm1, %v528_v4, 0.0  ;;  %v535_v7 = vsel %vm433_vm1, %v527_v5, 0.0  ;;  %v541_v12 = vsel %vm433_vm1, %v529_v8, 0.0  ;;  %v544_v13 = vsel %vm433_vm1, %v530_v9, 0.0 }
 0x17e   : > { %539 = vadd.xlane.f32.xlu0 %v538_v6  ;;  %536 = vadd.xlane.f32.xlu1 %v535_v7  ;;  %v547_v18 = vsel %vm433_vm1, %v531_v14, 0.0  ;;  %v550_v19 = vsel %vm433_vm1, %v532_v15, 0.0  ;;  %v553_v22 = vsel %vm433_vm1, %v533_v20, 0.0  ;;  %v556_v23 = vsel %vm433_vm1, %v534_v21, 0.0 }
 0x182   : > { %542 = vadd.xlane.f32.xlu0 %v541_v12  ;;  %545 = vadd.xlane.f32.xlu1 %v544_v13 }
 0x186   : > { %548 = vadd.xlane.f32.xlu0 %v547_v18  ;;  %551 = vadd.xlane.f32.xlu1 %v550_v19 }
 0x18a   : > { %554 = vadd.xlane.f32.xlu0 %v553_v22  ;;  %557 = vadd.xlane.f32.xlu1 %v556_v23 }
 0x207   : > { %v540_v24 = vpop.xlane.xlu0 %539  ;;  %v537_v25 = vpop.xlane.xlu1 %536 }
 0x208   : > { %v705_v26 = vmul.f32 -1.442695, %v540_v24  ;;  %v704_v27 = vmul.f32 -1.442695, %v537_v25 }
 0x20a   : > { %778 = vpow2.f32 %v705_v26 }
 0x20b   : > { %780 = vpow2.f32 %v704_v27  ;;  %v543_v28 = vpop.xlane.xlu0 %542  ;;  %v546_v29 = vpop.xlane.xlu1 %545 }
 0x20c   : > { %v706_v30 = vmul.f32 -1.442695, %v543_v28  ;;  %v707_v31 = vmul.f32 -1.442695, %v546_v29 }
 0x20e   : > { %782 = vpow2.f32 %v706_v30 }
 0x20f   : > { %784 = vpow2.f32 %v707_v31  ;;  %v549_v32 = vpop.xlane.xlu0 %548  ;;  %v552_v33 = vpop.xlane.xlu1 %551 }
 0x210   : > { %v708_v34 = vmul.f32 -1.442695, %v549_v32  ;;  %v709_v35 = vmul.f32 -1.442695, %v552_v33 }
 0x212   : > { %786 = vpow2.f32 %v708_v34 }
 0x213   : > { %788 = vpow2.f32 %v709_v35  ;;  %v555_v36 = vpop.xlane.xlu0 %554  ;;  %v558_v37 = vpop.xlane.xlu1 %557 }
 0x214   : > { %v710_v38 = vmul.f32 -1.442695, %v555_v36  ;;  %v711_v39 = vmul.f32 -1.442695, %v558_v37 }
 0x216   : > { %790 = vpow2.f32 %v710_v38 }
 0x217   : > { %v779_v40 = vpop.eup %778  ;;  %792 = vpow2.f32 %v711_v39 }
 0x218   : > { %v781_v41 = vpop.eup %780  ;;  %v584_v42 = vadd.f32 1.0, %v779_v40 }
 0x219   : > { %v583_v43 = vadd.f32 1.0, %v781_v41 }
 0x21a   : > { %794 = vrcp.f32 %v584_v42 }
 0x21b   : > { %v783_v44 = vpop.eup %782  ;;  %796 = vrcp.f32 %v583_v43 }
 0x21c   : > { %v785_v45 = vpop.eup %784  ;;  %v585_v46 = vadd.f32 1.0, %v783_v44 }
 0x21d   : > { %v586_v47 = vadd.f32 1.0, %v785_v45 }
 0x21e   : > { %798 = vrcp.f32 %v585_v46 }
 0x21f   : > { %v787_v48 = vpop.eup %786  ;;  %800 = vrcp.f32 %v586_v47 }
 0x220   : > { %v789_v49 = vpop.eup %788  ;;  %v587_v50 = vadd.f32 1.0, %v787_v48 }
 0x221   : > { %v588_v51 = vadd.f32 1.0, %v789_v49 }
 0x222   : > { %802 = vrcp.f32 %v587_v50 }
 0x223   : > { %v791_v52 = vpop.eup %790  ;;  %804 = vrcp.f32 %v588_v51 }
 0x224   : > { %v793_v53 = vpop.eup %792  ;;  %v589_v54 = vadd.f32 1.0, %v791_v52 }
 0x225   : > { %v590_v55 = vadd.f32 1.0, %v793_v53 }
 0x226   : > { %806 = vrcp.f32 %v589_v54 }
 0x227   : > { %v795_v56 = vpop.eup %794  ;;  %808 = vrcp.f32 %v590_v55 }
 0x228   : > { %v797_v57 = vpop.eup %796  ;;  %608 = vst.msk [vmem:[%s207_s18 + $0x8] sm:$0xff] %vm212_vm0, %v795_v56 }
 0x229   : > { %607 = vst.msk [vmem:[%s207_s18] sm:$0xff] %vm212_vm0, %v797_v57 }
 0x22b   : > { %v799_v58 = vpop.eup %798 }
 0x22c   : > { %v801_v59 = vpop.eup %800  ;;  %609 = vst.msk [vmem:[%s207_s18 + $0x10] sm:$0xff] %vm212_vm0, %v799_v58 }
 0x22d   : > { %610 = vst.msk [vmem:[%s207_s18 + $0x18] sm:$0xff] %vm212_vm0, %v801_v59 }
 0x22f   : > { %v803_v60 = vpop.eup %802 }
 0x230   : > { %v805_v61 = vpop.eup %804  ;;  %611 = vst.msk [vmem:[%s207_s18 + $0x20] sm:$0xff] %vm212_vm0, %v803_v60 }
 0x231   : > { %612 = vst.msk [vmem:[%s207_s18 + $0x28] sm:$0xff] %vm212_vm0, %v805_v61 }
 0x233   : > { %v807_v62 = vpop.eup %806 }
 0x234   : > { %v809_v63 = vpop.eup %808  ;;  %613 = vst.msk [vmem:[%s207_s18 + $0x30] sm:$0xff] %vm212_vm0, %v807_v62 }
 0x235   : > { %614 = vst.msk [vmem:[%s207_s18 + $0x38] sm:$0xff] %vm212_vm0, %v809_v63 }
 0x236 PF: > { %s16_s17 = sadd.s32 1, %s888_s17   ;;  %s1149_s12 = smov %s872_s13 }
 0x237   : > { %p13_p8 = scmp.ge.s32.totalorder %s16_s17, 4   ;;  %s1150_s13 = smov %s876_s14 }
 0x238   : > { %s1151_s14 = smov %s965_s24  ;;  %s1152_s15 = smov %s884_s16 }
 0x239   : > { %s1153_s16 = smov %s1155_s19  ;;  %15 = sbr.rel (!%p13_p8) target bundleno = 4 (0x4), region = 80 }
 0x23e   :  { %636 = vsyncpa [#allocation5], 1 }
 0x23f   :  { %638 = vsyncpa [#allocation5 + $0x1], 1 }

</bundles_post_ra>
